<compile_context>
chip_gen: v7x
topology: tpu7x:2x2x1
jax: 0.10.0
libtpu: 0.0.40
codegen_flags: <defaults>
</compile_context>

<pallas_src>
import functools

import jax
import jax.numpy as jnp
import numpy as np
from jax import lax
from jax.experimental import pallas as pl
from jax.experimental.pallas import tpu as pltpu

EARTH_RADIUS_KM = 6371.0
SMOOTH_TAU_KM = 75.0
NUM_CANDIDATES = 5

_NEG_BIG = -1e30   # finite "-inf" for masked columns (keeps exp/mul NaN-free)
_DIST_BIG = 1e30   # distance pad so padded geocells get ~zero smooth-label mass


def _round_up(x, m):
    return ((x + m - 1) // m) * m


def _divisor_tile(n, cap, quantum):
    """Largest t <= cap with t % quantum == 0 and n % t == 0; else full n."""
    if n <= cap:
        return n
    t = (min(cap, n) // quantum) * quantum
    while t >= quantum:
        if n % t == 0:
            return t
        t -= quantum
    return n


def _vmem_budget_bytes():
    """Per-generation VMEM budget with headroom for compiler scratch."""
    try:
        cap = int(pltpu.get_tpu_info().vmem_capacity_bytes)
    except Exception:
        cap = 64 << 20            # conservative default (v7x per-core VMEM)
    return max(32 << 20, cap - (12 << 20))


# ---------------------------------------------------------------------------
# Kernel 1: mean-pool over the sequence axis.
# grid = (B // pool_b_tile, ceil(S / s_tile)); S is the reduction axis and the
# (b_tile, H) f32 output block stays VMEM-resident across it.  Ragged last
# S tile handled by masking (no pad of the big hidden tensor).
# ---------------------------------------------------------------------------
def _pool_kernel(hidden_ref, emb_ref, *, inv_seq_len, seq_len, mask_seq):
    s = pl.program_id(1)

    @pl.when(s == 0)
    def _():
        emb_ref[...] = jnp.zeros(emb_ref.shape, emb_ref.dtype)

    # Fold the (bf16/f32 -> f32) cast into the per-tile reduction.
    x = hidden_ref[...].astype(jnp.float32)
    if mask_seq:
        s_tile = hidden_ref.shape[1]
        row = lax.broadcasted_iota(jnp.int32, x.shape, 1) + s * s_tile
        x = jnp.where(row < seq_len, x, 0.0)     # where (not mul): OOB may be NaN
    emb_ref[...] += jnp.sum(x, axis=1)

    @pl.when(s == pl.num_programs(1) - 1)
    def _():
        emb_ref[...] = emb_ref[...] * inv_seq_len


# ---------------------------------------------------------------------------
# Kernel 2: bf16 MXU linear + online softmax stats / argmax / smooth-label CE,
# tiled over the geocell axis C (reduction axis, innermost).
# ---------------------------------------------------------------------------
def _head_kernel(emb_ref, w_ref, b_ref, dist_ref,
                 logits_ref, lse_ref, loss_ref, preds_ref,
                 m_l, s_l, m_n, s_n, t_acc, best_v, best_i,
                 *, num_cells, inv_tau):
    c = pl.program_id(1)
    nc = pl.num_programs(1)

    @pl.when(c == 0)
    def _():
        m_l[...] = jnp.full(m_l.shape, -jnp.inf, m_l.dtype)
        s_l[...] = jnp.zeros(s_l.shape, s_l.dtype)
        m_n[...] = jnp.full(m_n.shape, -jnp.inf, m_n.dtype)
        s_n[...] = jnp.zeros(s_n.shape, s_n.dtype)
        t_acc[...] = jnp.zeros(t_acc.shape, t_acc.dtype)
        best_v[...] = jnp.full(best_v.shape, -jnp.inf, best_v.dtype)
        best_i[...] = jnp.zeros(best_i.shape, best_i.dtype)

    # logits tile = emb @ W[:, c-tile] + b[c-tile]; bf16 operands, f32 accum.
    logits = jnp.dot(emb_ref[...].astype(jnp.bfloat16), w_ref[...],
                     preferred_element_type=jnp.float32) + b_ref[...]
    logits_ref[...] = logits

    # explicit column-validity mask (padded C columns never leak into stats)
    ct = logits.shape[-1]
    col = lax.broadcasted_iota(jnp.int32, logits.shape, 1) + c * ct
    valid = col < num_cells
    vlog = jnp.where(valid, logits, _NEG_BIG)

    # --- online log-sum-exp over C (softmax denominator) --------------------
    tile_max = jnp.max(vlog, axis=-1, keepdims=True)
    new_m = jnp.maximum(m_l[...], tile_max)
    s_l[...] = (s_l[...] * jnp.exp(m_l[...] - new_m)
                + jnp.sum(jnp.exp(vlog - new_m), axis=-1, keepdims=True))
    m_l[...] = new_m

    # --- online argmax (first-occurrence, matches jnp/torch argmax) ---------
    local_idx = jnp.min(jnp.where(vlog == tile_max, col, jnp.int32(2 ** 30)),
                        axis=-1, keepdims=True)
    take = tile_max > best_v[...]
    best_i[...] = jnp.where(take, local_idx, best_i[...])
    best_v[...] = jnp.where(take, tile_max, best_v[...])

    # --- online smooth-label softmax + soft-label CE dot product ------------
    n = jnp.where(valid, dist_ref[...] * (-inv_tau), _NEG_BIG)
    n_max = jnp.max(n, axis=-1, keepdims=True)
    new_mn = jnp.maximum(m_n[...], n_max)
    alpha = jnp.exp(m_n[...] - new_mn)
    e_n = jnp.where(valid, jnp.exp(n - new_mn), 0.0)
    s_n[...] = alpha * s_n[...] + jnp.sum(e_n, axis=-1, keepdims=True)
    t_acc[...] = alpha * t_acc[...] + jnp.sum(e_n * logits, axis=-1,
                                              keepdims=True)
    m_n[...] = new_mn

    @pl.when(c == nc - 1)
    def _():
        lse = m_l[...] + jnp.log(s_l[...])                       # (bt, 1)
        # CE with soft labels p:  loss = logsumexp(logits) - sum_c p_c logit_c
        loss = lse - t_acc[...] * pl.reciprocal(s_n[...], approx=True)
        # lane-dense (bt, 128) output slabs (avoid masked partial stores)
        lse_ref[...] = jnp.broadcast_to(lse, lse_ref.shape)
        loss_ref[...] = jnp.broadcast_to(loss, loss_ref.shape)
        preds_ref[...] = jnp.broadcast_to(best_i[...], preds_ref.shape)


def geo_head(hidden, w_pad, b_pad, dist_pad, *, num_cells,
             b_tile=None, s_tile=None, c_tile=None):
    """Fused mean-pool + linear head + online softmax/argmax/smooth-label CE.

    hidden   : (B, S, H) f32/bf16   backbone last_hidden_state (fed as-is)
    w_pad    : (H, C_pad) bf16      cell_layer weight, C padded to 128 (prep'd once)
    b_pad    : (1, C_pad) f32       cell_layer bias, zero-padded
    dist_pad : (B, C_pad) f32       haversine distances, padded with _DIST_BIG
    returns (emb (B,H) f32, logits (B,C) f32, lse (B,1) f32,
             preds (B,) i32, per-sample loss (B,) f32)
    """
    B, S, H = hidden.shape
    C_pad = w_pad.shape[1]
    C = num_cells
    budget = _vmem_budget_bytes()
    hid_item = hidden.dtype.itemsize

    # ---- adaptive tiles: divisor-or-full so the big tensors need no padding ----
    if b_tile is None:
        # pool: >=2 batch tiles when possible so both v7x TensorCores work.
        pool_b_tile = _divisor_tile(B, max(8, min(128, B // 2)), 8)
        # head: maximize b_tile -- W is re-streamed from HBM once per batch tile.
        head_b_tile = _divisor_tile(B, 256, 8)
    else:
        pool_b_tile = head_b_tile = b_tile
    if s_tile is None:
        s_quant = 8 if hid_item >= 4 else 16      # bf16 packs 16 rows per vreg
        row_bytes = max(1, pool_b_tile * H * hid_item)
        s_cap = max(s_quant, ((budget // 3) // row_bytes) // s_quant * s_quant)
        s_tile = S if S <= s_cap else int(min(s_cap, 512))
    if c_tile is None:
        per_col = 2 * (H * 2 + 4 + head_b_tile * 4) + 2 * head_b_tile * 4
        c_cap = max(128, min(4096, ((budget // 2) // per_col) // 128 * 128))
        c_tile = _divisor_tile(C_pad, c_cap, 128)

    # ---------------- phase 1: mean pool (hidden read exactly once) ---------
    pool_need = (2 * pool_b_tile * s_tile * H * hid_item
                 + 2 * pool_b_tile * H * 4 + (4 << 20))
    pool_vmem = int(min(budget, max(pool_need, 16 << 20)))

    emb = pl.pallas_call(
        functools.partial(_pool_kernel, inv_seq_len=1.0 / S, seq_len=S,
                          mask_seq=(S % s_tile != 0)),
        out_shape=jax.ShapeDtypeStruct((B, H), jnp.float32),
        grid_spec=pltpu.PrefetchScalarGridSpec(
            num_scalar_prefetch=0,
            grid=(pl.cdiv(B, pool_b_tile), pl.cdiv(S, s_tile)),
            in_specs=[pl.BlockSpec((pool_b_tile, s_tile, H),
                                   lambda i, s: (i, s, 0))],
            out_specs=pl.BlockSpec((pool_b_tile, H), lambda i, s: (i, 0)),
        ),
        compiler_params=pltpu.CompilerParams(
            dimension_semantics=("parallel", "arbitrary"),
            vmem_limit_bytes=pool_vmem),
    )(hidden)

    # ---------------- phase 2: C-tiled bf16 MXU head + online stats ---------
    head_need = (2 * (head_b_tile * H * 4 + H * c_tile * 2 + c_tile * 4
                      + head_b_tile * c_tile * 4)
                 + 2 * head_b_tile * c_tile * 4
                 + 9 * head_b_tile * 128 * 4 * 2
                 + (4 << 20))
    head_vmem = int(min(budget, max(head_need, 16 << 20)))

    logits_p, lse, loss, preds = pl.pallas_call(
        functools.partial(_head_kernel, num_cells=C,
                          inv_tau=1.0 / SMOOTH_TAU_KM),
        out_shape=(
            jax.ShapeDtypeStruct((B, C_pad), jnp.float32),   # logits
            jax.ShapeDtypeStruct((B, 128), jnp.float32),     # logsumexp
            jax.ShapeDtypeStruct((B, 128), jnp.float32),     # per-sample CE
            jax.ShapeDtypeStruct((B, 128), jnp.int32),       # argmax preds
        ),
        grid_spec=pltpu.PrefetchScalarGridSpec(
            num_scalar_prefetch=0,
            grid=(pl.cdiv(B, head_b_tile), C_pad // c_tile),
            in_specs=[
                pl.BlockSpec((head_b_tile, H), lambda i, c: (i, 0)),
                pl.BlockSpec((H, c_tile), lambda i, c: (0, c)),
                pl.BlockSpec((1, c_tile), lambda i, c: (0, c)),
                pl.BlockSpec((head_b_tile, c_tile), lambda i, c: (i, c)),
            ],
            out_specs=(
                pl.BlockSpec((head_b_tile, c_tile), lambda i, c: (i, c)),
                pl.BlockSpec((head_b_tile, 128), lambda i, c: (i, 0)),
                pl.BlockSpec((head_b_tile, 128), lambda i, c: (i, 0)),
                pl.BlockSpec((head_b_tile, 128), lambda i, c: (i, 0)),
            ),
            scratch_shapes=[pltpu.VMEM((head_b_tile, 1), jnp.float32)] * 6
                          + [pltpu.VMEM((head_b_tile, 1), jnp.int32)],
        ),
        compiler_params=pltpu.CompilerParams(
            dimension_semantics=("parallel", "arbitrary"),
            vmem_limit_bytes=head_vmem),
    )(emb, w_pad, b_pad, dist_pad)

    return emb, logits_p[:, :C], lse[:, 0:1], preds[:, 0], loss[:, 0]


def haversine_matrix(labels_deg, cells_deg):
    """Pairwise haversine distance (km). labels (B,2), cells (C,2), [lon,lat]."""
    lab = jnp.deg2rad(labels_deg.astype(jnp.float32))
    cel = jnp.deg2rad(cells_deg.astype(jnp.float32))
    lon1, lat1 = lab[:, 0:1], lab[:, 1:2]                      # (B, 1)
    lon2, lat2 = cel[:, 0][None, :], cel[:, 1][None, :]        # (1, C)
    dlat = lat2 - lat1
    dlon = lon2 - lon1
    a = (jnp.sin(dlat * 0.5) ** 2
         + jnp.cos(lat1) * jnp.cos(lat2) * jnp.sin(dlon * 0.5) ** 2)
    # TODO(synk): arcsin has no Mosaic lowering -> plain-JAX glue on (B,C).
    return 2.0 * EARTH_RADIUS_KM * jnp.arcsin(jnp.sqrt(jnp.clip(a, 0.0, 1.0)))


def init_params(key, hidden_size, num_cells):
    kw, kb, kg = jax.random.split(key, 3)
    w = jax.random.normal(kw, (hidden_size, num_cells), jnp.float32) * 0.02
    b = jax.random.normal(kb, (1, num_cells), jnp.float32) * 0.02
    lon = jax.random.uniform(kg, (num_cells, 1), jnp.float32, -180.0, 180.0)
    lat = jax.random.uniform(jax.random.fold_in(kg, 1),
                             (num_cells, 1), jnp.float32, -90.0, 90.0)
    geocells = jnp.concatenate([lon, lat], axis=1)             # (C,2) [lon,lat]
    return {"w": w, "b": b, "geocells": geocells}


def prepare_params(params):
    """One-time prep hoisted OUT of the per-forward jit: pad C to a multiple of
    128 and store W in bf16 (the head kernel is HBM-BW-bound on the W stream)."""
    C = params["w"].shape[1]
    C_pad = _round_up(C, 128)
    w_pad = jnp.pad(params["w"].astype(jnp.float32),
                    ((0, 0), (0, C_pad - C))).astype(jnp.bfloat16)
    b_pad = jnp.pad(params["b"].astype(jnp.float32), ((0, 0), (0, C_pad - C)))
    return {"w_pad": w_pad, "b_pad": b_pad,
            "geocells": params["geocells"].astype(jnp.float32)}


@jax.jit
def geolocation_forward(prep, last_hidden_state, labels_deg):
    # NOTE: last_hidden_state is consumed in its native dtype (no wrapper cast
    # -- the pool kernel casts per tile while accumulating in f32).
    geocells = prep["geocells"]
    C = geocells.shape[0]
    C_pad = prep["w_pad"].shape[1]
    dist = haversine_matrix(labels_deg, geocells)               # (B, C) small
    dist_pad = jnp.pad(dist, ((0, 0), (0, C_pad - C)),
                       constant_values=_DIST_BIG)               # single small pad
    emb, logits, lse, preds, loss_per = geo_head(
        last_hidden_state, prep["w_pad"], prep["b_pad"], dist_pad, num_cells=C)
    pred_llh = jnp.take(geocells, preds, axis=0)                # index_select
    # TODO(synk): fuse top-5 selection into _head_kernel to avoid this XLA
    #             re-read of the (B, C) logits.
    topk_logits, topk_idx = jax.lax.top_k(logits, NUM_CANDIDATES)
    topk_probs = jnp.exp(topk_logits - lse)   # softmax values of the top-k
    loss_clf = jnp.mean(loss_per)             # CE batch mean
    # TODO(synk): refiner(embedding, initial_preds, candidates, probs) is an
    #             external injected module; loss_refine not reproduced.
    return {
        "pred": pred_llh,
        "loss": loss_clf,
        "preds_geocell": preds,
        "geocell_topk_indices": topk_idx,
        "geocell_topk_probs": topk_probs,
        "embedding": emb,
        "logits": logits,
    }


if __name__ == "__main__":
    # batch, seq, hidden_size, num_cells (small; C deliberately not a 128-multiple
    # so the padded-column masking path is exercised).
    B, S, H, C = 8, 24, 128, 380

    key = jax.random.PRNGKey(0)
    k_params, k_x, k_lab = jax.random.split(key, 3)

    params = init_params(k_params, H, C)
    prep = prepare_params(params)        # one-time param prep, outside the jit
    last_hidden_state = jax.random.normal(k_x, (B, S, H), jnp.float32)
    lab_lon = jax.random.uniform(k_lab, (B, 1), jnp.float32, -180.0, 180.0)
    lab_lat = jax.random.uniform(jax.random.fold_in(k_lab, 1),
                                 (B, 1), jnp.float32, -90.0, 90.0)
    labels = jnp.concatenate([lab_lon, lab_lat], axis=1)       # (B,2) [lon,lat]

    out = geolocation_forward(prep, last_hidden_state, labels)
    jax.block_until_ready(out)

    # ---- plain-JAX f32 reference --------------------------------------------
    emb_r = jnp.mean(last_hidden_state, axis=1)
    logits_r = emb_r @ params["w"] + params["b"]
    m = jnp.max(logits_r, axis=-1, keepdims=True)
    lse_r = m + jnp.log(jnp.sum(jnp.exp(logits_r - m), axis=-1, keepdims=True))
    dist_r = haversine_matrix(labels, params["geocells"])
    label_p = jax.nn.softmax(-dist_r / SMOOTH_TAU_KM, axis=-1)
    loss_r = jnp.mean(lse_r[:, 0] - jnp.sum(label_p * logits_r, axis=-1))

    np.testing.assert_allclose(np.asarray(out["embedding"]), np.asarray(emb_r),
                               rtol=1e-4, atol=1e-4)
    # tolerances allow for bf16 MXU operands vs the f32 reference
    np.testing.assert_allclose(np.asarray(out["logits"]), np.asarray(logits_r),
                               rtol=2e-2, atol=2e-2)
    np.testing.assert_allclose(np.asarray(out["loss"]), np.asarray(loss_r),
                               rtol=2e-2, atol=2e-2)
    # Online argmax must be self-consistent with the kernel's own logits.
    assert bool(jnp.array_equal(out["preds_geocell"],
                                jnp.argmax(out["logits"], axis=-1)))
    assert out["pred"].shape == (B, 2)
    assert out["geocell_topk_indices"].shape == (B, NUM_CANDIDATES)
    assert out["geocell_topk_probs"].shape == (B, NUM_CANDIDATES)
    assert bool(jnp.isfinite(out["loss"]))

    # ---- exercise the multi-tile / ragged / online paths with explicit tiles
    # (ragged last S tile masked, 3 C tiles -> online LSE/argmax/CE merging).
    C_pad = prep["w_pad"].shape[1]
    dist_pad2 = jnp.pad(dist_r, ((0, 0), (0, C_pad - C)),
                        constant_values=_DIST_BIG)
    emb2, logits2, lse2, preds2, loss2 = geo_head(
        last_hidden_state, prep["w_pad"], prep["b_pad"], dist_pad2,
        num_cells=C, b_tile=8, s_tile=16, c_tile=128)
    jax.block_until_ready(logits2)
    np.testing.assert_allclose(np.asarray(emb2), np.asarray(emb_r),
                               rtol=1e-4, atol=1e-4)
    np.testing.assert_allclose(np.asarray(logits2), np.asarray(out["logits"]),
                               rtol=1e-3, atol=1e-3)
    np.testing.assert_allclose(np.asarray(jnp.mean(loss2)),
                               np.asarray(out["loss"]), rtol=1e-3, atol=1e-3)
    assert bool(jnp.array_equal(preds2, jnp.argmax(logits2, axis=-1)))

    print("KERNEL_OK")
</pallas_src>

<mosaic_0001>
module attributes {stable_mosaic.version = 11 : i64} {
  func.func @_pool_kernel(%arg0: i32, %arg1: i32, %arg2: memref<8x24x128xf32, #tpu.memory_space<vmem>>, %arg3: memref<8x128xf32, #tpu.memory_space<vmem>>) attributes {dimension_semantics = [#tpu.dimension_semantics<parallel>, #tpu.dimension_semantics<arbitrary>], iteration_bounds = array<i64: 1, 1>, scalar_prefetch = 0 : i64, scratch_operands = 0 : i64, tpu.core_type = #tpu.core_type<tc>, window_params = [{transform_indices = @transform_0, window_bounds = array<i64: 8, 24, 128>}, {transform_indices = @transform_1, window_bounds = array<i64: 8, 128>}]} {
    %c0_i32 = arith.constant 0 : i32
    %0 = arith.cmpi eq, %arg1, %c0_i32 : i32
    %1 = arith.extui %0 : i1 to i32
    %c0_i32_0 = arith.constant 0 : i32
    %2 = arith.cmpi ne, %1, %c0_i32_0 : i32
    scf.if %2 {
      %cst_9 = arith.constant 0.000000e+00 : f32
      %11 = vector.broadcast %cst_9 : f32 to vector<8x128xf32>
      %c0_10 = arith.constant 0 : index
      %c0_11 = arith.constant 0 : index
      %12 = vector.load %arg3[%c0_10, %c0_11] : memref<8x128xf32, #tpu.memory_space<vmem>>, vector<8x128xf32>
      tpu.vector_store %arg3[%c0_10, %c0_11], %11 {strides = array<i32>} : memref<8x128xf32, #tpu.memory_space<vmem>>, vector<8x128xf32>,
    } else {
    }
    %c0 = arith.constant 0 : index
    %c0_1 = arith.constant 0 : index
    %c0_2 = arith.constant 0 : index
    %3 = vector.load %arg2[%c0, %c0_1, %c0_2] : memref<8x24x128xf32, #tpu.memory_space<vmem>>, vector<8x24x128xf32>
    %c0_3 = arith.constant 0 : index
    %c0_4 = arith.constant 0 : index
    %4 = vector.load %arg3[%c0_3, %c0_4] : memref<8x128xf32, #tpu.memory_space<vmem>>, vector<8x128xf32>
    %cst = arith.constant dense<0.000000e+00> : vector<8x128xf32>
    %5 = vector.multi_reduction <add>, %3, %cst [1] : vector<8x24x128xf32> to vector<8x128xf32>
    %6 = arith.addf %4, %5 : vector<8x128xf32>
    %c0_5 = arith.constant 0 : index
    %c0_6 = arith.constant 0 : index
    %7 = vector.load %arg3[%c0_5, %c0_6] : memref<8x128xf32, #tpu.memory_space<vmem>>, vector<8x128xf32>
    tpu.vector_store %arg3[%c0_5, %c0_6], %6 {strides = array<i32>} : memref<8x128xf32, #tpu.memory_space<vmem>>, vector<8x128xf32>,
    %c0_i32_7 = arith.constant 0 : i32
    %8 = arith.cmpi eq, %arg1, %c0_i32_7 : i32
    %9 = arith.extui %8 : i1 to i32
    %c0_i32_8 = arith.constant 0 : i32
    %10 = arith.cmpi ne, %9, %c0_i32_8 : i32
    scf.if %10 {
      %c0_9 = arith.constant 0 : index
      %c0_10 = arith.constant 0 : index
      %11 = vector.load %arg3[%c0_9, %c0_10] : memref<8x128xf32, #tpu.memory_space<vmem>>, vector<8x128xf32>
      %cst_11 = arith.constant 0.0416666679 : f32
      %12 = vector.broadcast %cst_11 : f32 to vector<8x128xf32>
      %13 = arith.mulf %11, %12 : vector<8x128xf32>
      %c0_12 = arith.constant 0 : index
      %c0_13 = arith.constant 0 : index
      %14 = vector.load %arg3[%c0_12, %c0_13] : memref<8x128xf32, #tpu.memory_space<vmem>>, vector<8x128xf32>
      tpu.vector_store %arg3[%c0_12, %c0_13], %13 {strides = array<i32>} : memref<8x128xf32, #tpu.memory_space<vmem>>, vector<8x128xf32>,
    } else {
    }
    return
  }
  func.func @transform_0(%arg0: i32, %arg1: i32) -> (i32, i32, i32) {
    %c0_i32 = arith.constant 0 : i32
    %c0_i32_0 = arith.constant 0 : i32
    return %arg0, %arg1, %c0_i32 : i32, i32, i32
  }
  func.func @transform_1(%arg0: i32, %arg1: i32) -> (i32, i32) {
    %c0_i32 = arith.constant 0 : i32
    %c0_i32_0 = arith.constant 0 : i32
    return %arg0, %c0_i32 : i32, i32
  }
}

module attributes {stable_mosaic.version = 11 : i64} {
  func.func @_head_kernel(%arg0: i32, %arg1: i32, %arg2: memref<8x128xf32, #tpu.memory_space<vmem>>, %arg3: memref<128x384xbf16, #tpu.memory_space<vmem>>, %arg4: memref<1x384xf32, #tpu.memory_space<vmem>>, %arg5: memref<8x384xf32, #tpu.memory_space<vmem>>, %arg6: memref<8x384xf32, #tpu.memory_space<vmem>>, %arg7: memref<8x128xf32, #tpu.memory_space<vmem>>, %arg8: memref<8x128xf32, #tpu.memory_space<vmem>>, %arg9: memref<8x128xi32, #tpu.memory_space<vmem>>, %arg10: memref<8x1xf32, #tpu.memory_space<vmem>>, %arg11: memref<8x1xf32, #tpu.memory_space<vmem>>, %arg12: memref<8x1xf32, #tpu.memory_space<vmem>>, %arg13: memref<8x1xf32, #tpu.memory_space<vmem>>, %arg14: memref<8x1xf32, #tpu.memory_space<vmem>>, %arg15: memref<8x1xf32, #tpu.memory_space<vmem>>, %arg16: memref<8x1xi32, #tpu.memory_space<vmem>>) attributes {dimension_semantics = [#tpu.dimension_semantics<parallel>, #tpu.dimension_semantics<arbitrary>], iteration_bounds = array<i64: 1, 1>, scalar_prefetch = 0 : i64, scratch_operands = 7 : i64, tpu.core_type = #tpu.core_type<tc>, window_params = [{transform_indices = @transform_0, window_bounds = array<i64: 8, 128>}, {transform_indices = @transform_1, window_bounds = array<i64: 128, 384>}, {transform_indices = @transform_2, window_bounds = array<i64: 1, 384>}, {transform_indices = @transform_3, window_bounds = array<i64: 8, 384>}, {transform_indices = @transform_4, window_bounds = array<i64: 8, 384>}, {transform_indices = @transform_5, window_bounds = array<i64: 8, 128>}, {transform_indices = @transform_6, window_bounds = array<i64: 8, 128>}, {transform_indices = @transform_7, window_bounds = array<i64: 8, 128>}]} {
    %c0_i32 = arith.constant 0 : i32
    %0 = arith.cmpi eq, %arg1, %c0_i32 : i32
    %1 = arith.extui %0 : i1 to i32
    %c0_i32_0 = arith.constant 0 : i32
    %2 = arith.cmpi ne, %1, %c0_i32_0 : i32
    scf.if %2 {
      %cst_56 = arith.constant 0xFF800000 : f32
      %84 = vector.broadcast %cst_56 : f32 to vector<8x1xf32>
      %c0_57 = arith.constant 0 : index
      %c0_58 = arith.constant 0 : index
      %85 = vector.load %arg10[%c0_57, %c0_58] : memref<8x1xf32, #tpu.memory_space<vmem>>, vector<8x1xf32>
      tpu.vector_store %arg10[%c0_57, %c0_58], %84 {strides = array<i32>} : memref<8x1xf32, #tpu.memory_space<vmem>>, vector<8x1xf32>,
      %cst_59 = arith.constant 0.000000e+00 : f32
      %86 = vector.broadcast %cst_59 : f32 to vector<8x1xf32>
      %c0_60 = arith.constant 0 : index
      %c0_61 = arith.constant 0 : index
      %87 = vector.load %arg11[%c0_60, %c0_61] : memref<8x1xf32, #tpu.memory_space<vmem>>, vector<8x1xf32>
      tpu.vector_store %arg11[%c0_60, %c0_61], %86 {strides = array<i32>} : memref<8x1xf32, #tpu.memory_space<vmem>>, vector<8x1xf32>,
      %cst_62 = arith.constant 0xFF800000 : f32
      %88 = vector.broadcast %cst_62 : f32 to vector<8x1xf32>
      %c0_63 = arith.constant 0 : index
      %c0_64 = arith.constant 0 : index
      %89 = vector.load %arg12[%c0_63, %c0_64] : memref<8x1xf32, #tpu.memory_space<vmem>>, vector<8x1xf32>
      tpu.vector_store %arg12[%c0_63, %c0_64], %88 {strides = array<i32>} : memref<8x1xf32, #tpu.memory_space<vmem>>, vector<8x1xf32>,
      %cst_65 = arith.constant 0.000000e+00 : f32
      %90 = vector.broadcast %cst_65 : f32 to vector<8x1xf32>
      %c0_66 = arith.constant 0 : index
      %c0_67 = arith.constant 0 : index
      %91 = vector.load %arg13[%c0_66, %c0_67] : memref<8x1xf32, #tpu.memory_space<vmem>>, vector<8x1xf32>
      tpu.vector_store %arg13[%c0_66, %c0_67], %90 {strides = array<i32>} : memref<8x1xf32, #tpu.memory_space<vmem>>, vector<8x1xf32>,
      %cst_68 = arith.constant 0.000000e+00 : f32
      %92 = vector.broadcast %cst_68 : f32 to vector<8x1xf32>
      %c0_69 = arith.constant 0 : index
      %c0_70 = arith.constant 0 : index
      %93 = vector.load %arg14[%c0_69, %c0_70] : memref<8x1xf32, #tpu.memory_space<vmem>>, vector<8x1xf32>
      tpu.vector_store %arg14[%c0_69, %c0_70], %92 {strides = array<i32>} : memref<8x1xf32, #tpu.memory_space<vmem>>, vector<8x1xf32>,
      %cst_71 = arith.constant 0xFF800000 : f32
      %94 = vector.broadcast %cst_71 : f32 to vector<8x1xf32>
      %c0_72 = arith.constant 0 : index
      %c0_73 = arith.constant 0 : index
      %95 = vector.load %arg15[%c0_72, %c0_73] : memref<8x1xf32, #tpu.memory_space<vmem>>, vector<8x1xf32>
      tpu.vector_store %arg15[%c0_72, %c0_73], %94 {strides = array<i32>} : memref<8x1xf32, #tpu.memory_space<vmem>>, vector<8x1xf32>,
      %c0_i32_74 = arith.constant 0 : i32
      %96 = vector.broadcast %c0_i32_74 : i32 to vector<8x1xi32>
      %c0_75 = arith.constant 0 : index
      %c0_76 = arith.constant 0 : index
      %97 = vector.load %arg16[%c0_75, %c0_76] : memref<8x1xi32, #tpu.memory_space<vmem>>, vector<8x1xi32>
      tpu.vector_store %arg16[%c0_75, %c0_76], %96 {strides = array<i32>} : memref<8x1xi32, #tpu.memory_space<vmem>>, vector<8x1xi32>,
    } else {
    }
    %c0 = arith.constant 0 : index
    %c0_1 = arith.constant 0 : index
    %3 = vector.load %arg2[%c0, %c0_1] : memref<8x128xf32, #tpu.memory_space<vmem>>, vector<8x128xf32>
    %4 = arith.truncf %3 : vector<8x128xf32> to vector<8x128xbf16>
    %c0_2 = arith.constant 0 : index
    %c0_3 = arith.constant 0 : index
    %5 = vector.load %arg3[%c0_2, %c0_3] : memref<128x384xbf16, #tpu.memory_space<vmem>>, vector<128x384xbf16>
    %cst = arith.constant dense<0.000000e+00> : vector<8x384xf32>
    %6 = tpu.matmul %4, %5, %cst {dimension_numbers = #tpu.dot_dimension_numbers<[1], [0], [0], [1], [0, 0, 1, 1], [], []>} : vector<8x128xbf16>, vector<128x384xbf16>, vector<8x384xf32> -> vector<8x384xf32>
    %c0_4 = arith.constant 0 : index
    %c0_5 = arith.constant 0 : index
    %7 = vector.load %arg4[%c0_4, %c0_5] : memref<1x384xf32, #tpu.memory_space<vmem>>, vector<1x384xf32>
    %8 = vector.broadcast %7 : vector<1x384xf32> to vector<8x384xf32>
    %9 = arith.addf %6, %8 : vector<8x384xf32>
    %c0_6 = arith.constant 0 : index
    %c0_7 = arith.constant 0 : index
    %10 = vector.load %arg6[%c0_6, %c0_7] : memref<8x384xf32, #tpu.memory_space<vmem>>, vector<8x384xf32>
    tpu.vector_store %arg6[%c0_6, %c0_7], %9 {strides = array<i32>} : memref<8x384xf32, #tpu.memory_space<vmem>>, vector<8x384xf32>,
    %11 = tpu.iota {dimensions = array<i32: 1>} : vector<8x384xi32>
    %c384_i32 = arith.constant 384 : i32
    %12 = arith.muli %arg1, %c384_i32 : i32
    %13 = vector.broadcast %12 : i32 to vector<8x384xi32>
    %14 = arith.addi %11, %13 : vector<8x384xi32>
    %c380_i32 = arith.constant 380 : i32
    %15 = vector.broadcast %c380_i32 : i32 to vector<8x384xi32>
    %16 = arith.cmpi slt, %14, %15 : vector<8x384xi32>
    %cst_8 = arith.constant -1.000000e+30 : f32
    %17 = vector.broadcast %cst_8 : f32 to vector<8x384xf32>
    %18 = arith.select %16, %9, %17 : vector<8x384xi1>, vector<8x384xf32>
    %cst_9 = arith.constant dense<0xFF800000> : vector<8xf32>
    %19 = vector.multi_reduction <maximumf>, %18, %cst_9 [1] : vector<8x384xf32> to vector<8xf32>
    %20 = vector.shape_cast %19 : vector<8xf32> to vector<8x1xf32>
    %c0_10 = arith.constant 0 : index
    %c0_11 = arith.constant 0 : index
    %21 = vector.load %arg10[%c0_10, %c0_11] : memref<8x1xf32, #tpu.memory_space<vmem>>, vector<8x1xf32>
    %22 = arith.maximumf %21, %20 : vector<8x1xf32>
    %c0_12 = arith.constant 0 : index
    %c0_13 = arith.constant 0 : index
    %23 = vector.load %arg11[%c0_12, %c0_13] : memref<8x1xf32, #tpu.memory_space<vmem>>, vector<8x1xf32>
    %c0_14 = arith.constant 0 : index
    %c0_15 = arith.constant 0 : index
    %24 = vector.load %arg10[%c0_14, %c0_15] : memref<8x1xf32, #tpu.memory_space<vmem>>, vector<8x1xf32>
    %25 = arith.subf %24, %22 : vector<8x1xf32>
    %26 = math.exp %25 : vector<8x1xf32>
    %27 = arith.mulf %23, %26 : vector<8x1xf32>
    %28 = vector.broadcast %22 : vector<8x1xf32> to vector<8x384xf32>
    %29 = arith.subf %18, %28 : vector<8x384xf32>
    %30 = math.exp %29 : vector<8x384xf32>
    %cst_16 = arith.constant dense<0.000000e+00> : vector<8xf32>
    %31 = vector.multi_reduction <add>, %30, %cst_16 [1] : vector<8x384xf32> to vector<8xf32>
    %32 = vector.shape_cast %31 : vector<8xf32> to vector<8x1xf32>
    %33 = arith.addf %27, %32 : vector<8x1xf32>
    %c0_17 = arith.constant 0 : index
    %c0_18 = arith.constant 0 : index
    %34 = vector.load %arg11[%c0_17, %c0_18] : memref<8x1xf32, #tpu.memory_space<vmem>>, vector<8x1xf32>
    tpu.vector_store %arg11[%c0_17, %c0_18], %33 {strides = array<i32>} : memref<8x1xf32, #tpu.memory_space<vmem>>, vector<8x1xf32>,
    %c0_19 = arith.constant 0 : index
    %c0_20 = arith.constant 0 : index
    %35 = vector.load %arg10[%c0_19, %c0_20] : memref<8x1xf32, #tpu.memory_space<vmem>>, vector<8x1xf32>
    tpu.vector_store %arg10[%c0_19, %c0_20], %22 {strides = array<i32>} : memref<8x1xf32, #tpu.memory_space<vmem>>, vector<8x1xf32>,
    %36 = vector.broadcast %20 : vector<8x1xf32> to vector<8x384xf32>
    %37 = arith.cmpf oeq, %18, %36 : vector<8x384xf32>
    %c1073741824_i32 = arith.constant 1073741824 : i32
    %38 = vector.broadcast %c1073741824_i32 : i32 to vector<8x384xi32>
    %39 = arith.select %37, %14, %38 : vector<8x384xi1>, vector<8x384xi32>
    %cst_21 = arith.constant dense<2147483647> : vector<8xi32>
    %40 = vector.multi_reduction <minsi>, %39, %cst_21 [1] : vector<8x384xi32> to vector<8xi32>
    %41 = vector.shape_cast %40 : vector<8xi32> to vector<8x1xi32>
    %c0_22 = arith.constant 0 : index
    %c0_23 = arith.constant 0 : index
    %42 = vector.load %arg15[%c0_22, %c0_23] : memref<8x1xf32, #tpu.memory_space<vmem>>, vector<8x1xf32>
    %43 = arith.cmpf ogt, %20, %42 : vector<8x1xf32>
    %c0_24 = arith.constant 0 : index
    %c0_25 = arith.constant 0 : index
    %44 = vector.load %arg16[%c0_24, %c0_25] : memref<8x1xi32, #tpu.memory_space<vmem>>, vector<8x1xi32>
    %45 = arith.select %43, %41, %44 : vector<8x1xi1>, vector<8x1xi32>
    %c0_26 = arith.constant 0 : index
    %c0_27 = arith.constant 0 : index
    %46 = vector.load %arg16[%c0_26, %c0_27] : memref<8x1xi32, #tpu.memory_space<vmem>>, vector<8x1xi32>
    tpu.vector_store %arg16[%c0_26, %c0_27], %45 {strides = array<i32>} : memref<8x1xi32, #tpu.memory_space<vmem>>, vector<8x1xi32>,
    %c0_28 = arith.constant 0 : index
    %c0_29 = arith.constant 0 : index
    %47 = vector.load %arg15[%c0_28, %c0_29] : memref<8x1xf32, #tpu.memory_space<vmem>>, vector<8x1xf32>
    %48 = arith.select %43, %20, %47 : vector<8x1xi1>, vector<8x1xf32>
    %c0_30 = arith.constant 0 : index
    %c0_31 = arith.constant 0 : index
    %49 = vector.load %arg15[%c0_30, %c0_31] : memref<8x1xf32, #tpu.memory_space<vmem>>, vector<8x1xf32>
    tpu.vector_store %arg15[%c0_30, %c0_31], %48 {strides = array<i32>} : memref<8x1xf32, #tpu.memory_space<vmem>>, vector<8x1xf32>,
    %c0_32 = arith.constant 0 : index
    %c0_33 = arith.constant 0 : index
    %50 = vector.load %arg5[%c0_32, %c0_33] : memref<8x384xf32, #tpu.memory_space<vmem>>, vector<8x384xf32>
    %cst_34 = arith.constant -0.0133333337 : f32
    %51 = vector.broadcast %cst_34 : f32 to vector<8x384xf32>
    %52 = arith.mulf %50, %51 : vector<8x384xf32>
    %cst_35 = arith.constant -1.000000e+30 : f32
    %53 = vector.broadcast %cst_35 : f32 to vector<8x384xf32>
    %54 = arith.select %16, %52, %53 : vector<8x384xi1>, vector<8x384xf32>
    %cst_36 = arith.constant dense<0xFF800000> : vector<8xf32>
    %55 = vector.multi_reduction <maximumf>, %54, %cst_36 [1] : vector<8x384xf32> to vector<8xf32>
    %56 = vector.shape_cast %55 : vector<8xf32> to vector<8x1xf32>
    %c0_37 = arith.constant 0 : index
    %c0_38 = arith.constant 0 : index
    %57 = vector.load %arg12[%c0_37, %c0_38] : memref<8x1xf32, #tpu.memory_space<vmem>>, vector<8x1xf32>
    %58 = arith.maximumf %57, %56 : vector<8x1xf32>
    %c0_39 = arith.constant 0 : index
    %c0_40 = arith.constant 0 : index
    %59 = vector.load %arg12[%c0_39, %c0_40] : memref<8x1xf32, #tpu.memory_space<vmem>>, vector<8x1xf32>
    %60 = arith.subf %59, %58 : vector<8x1xf32>
    %61 = math.exp %60 : vector<8x1xf32>
    %62 = vector.broadcast %58 : vector<8x1xf32> to vector<8x384xf32>
    %63 = arith.subf %54, %62 : vector<8x384xf32>
    %64 = math.exp %63 : vector<8x384xf32>
    %cst_41 = arith.constant 0.000000e+00 : f32
    %65 = vector.broadcast %cst_41 : f32 to vector<8x384xf32>
    %66 = arith.select %16, %64, %65 : vector<8x384xi1>, vector<8x384xf32>
    %c0_42 = arith.constant 0 : index
    %c0_43 = arith.constant 0 : index
    %67 = vector.load %arg13[%c0_42, %c0_43] : memref<8x1xf32, #tpu.memory_space<vmem>>, vector<8x1xf32>
    %68 = arith.mulf %61, %67 : vector<8x1xf32>
    %cst_44 = arith.constant dense<0.000000e+00> : vector<8xf32>
    %69 = vector.multi_reduction <add>, %66, %cst_44 [1] : vector<8x384xf32> to vector<8xf32>
    %70 = vector.shape_cast %69 : vector<8xf32> to vector<8x1xf32>
    %71 = arith.addf %68, %70 : vector<8x1xf32>
    %c0_45 = arith.constant 0 : index
    %c0_46 = arith.constant 0 : index
    %72 = vector.load %arg13[%c0_45, %c0_46] : memref<8x1xf32, #tpu.memory_space<vmem>>, vector<8x1xf32>
    tpu.vector_store %arg13[%c0_45, %c0_46], %71 {strides = array<i32>} : memref<8x1xf32, #tpu.memory_space<vmem>>, vector<8x1xf32>,
    %c0_47 = arith.constant 0 : index
    %c0_48 = arith.constant 0 : index
    %73 = vector.load %arg14[%c0_47, %c0_48] : memref<8x1xf32, #tpu.memory_space<vmem>>, vector<8x1xf32>
    %74 = arith.mulf %61, %73 : vector<8x1xf32>
    %75 = arith.mulf %66, %9 : vector<8x384xf32>
    %cst_49 = arith.constant dense<0.000000e+00> : vector<8xf32>
    %76 = vector.multi_reduction <add>, %75, %cst_49 [1] : vector<8x384xf32> to vector<8xf32>
    %77 = vector.shape_cast %76 : vector<8xf32> to vector<8x1xf32>
    %78 = arith.addf %74, %77 : vector<8x1xf32>
    %c0_50 = arith.constant 0 : index
    %c0_51 = arith.constant 0 : index
    %79 = vector.load %arg14[%c0_50, %c0_51] : memref<8x1xf32, #tpu.memory_space<vmem>>, vector<8x1xf32>
    tpu.vector_store %arg14[%c0_50, %c0_51], %78 {strides = array<i32>} : memref<8x1xf32, #tpu.memory_space<vmem>>, vector<8x1xf32>,
    %c0_52 = arith.constant 0 : index
    %c0_53 = arith.constant 0 : index
    %80 = vector.load %arg12[%c0_52, %c0_53] : memref<8x1xf32, #tpu.memory_space<vmem>>, vector<8x1xf32>
    tpu.vector_store %arg12[%c0_52, %c0_53], %58 {strides = array<i32>} : memref<8x1xf32, #tpu.memory_space<vmem>>, vector<8x1xf32>,
    %c0_i32_54 = arith.constant 0 : i32
    %81 = arith.cmpi eq, %arg1, %c0_i32_54 : i32
    %82 = arith.extui %81 : i1 to i32
    %c0_i32_55 = arith.constant 0 : i32
    %83 = arith.cmpi ne, %82, %c0_i32_55 : i32
    scf.if %83 {
      %c0_56 = arith.constant 0 : index
      %c0_57 = arith.constant 0 : index
      %84 = vector.load %arg10[%c0_56, %c0_57] : memref<8x1xf32, #tpu.memory_space<vmem>>, vector<8x1xf32>
      %c0_58 = arith.constant 0 : index
      %c0_59 = arith.constant 0 : index
      %85 = vector.load %arg11[%c0_58, %c0_59] : memref<8x1xf32, #tpu.memory_space<vmem>>, vector<8x1xf32>
      %86 = math.log %85 : vector<8x1xf32>
      %87 = arith.addf %84, %86 : vector<8x1xf32>
      %c0_60 = arith.constant 0 : index
      %c0_61 = arith.constant 0 : index
      %88 = vector.load %arg14[%c0_60, %c0_61] : memref<8x1xf32, #tpu.memory_space<vmem>>, vector<8x1xf32>
      %c0_62 = arith.constant 0 : index
      %c0_63 = arith.constant 0 : index
      %89 = vector.load %arg13[%c0_62, %c0_63] : memref<8x1xf32, #tpu.memory_space<vmem>>, vector<8x1xf32>
      %90 = tpu.reciprocal %89 {approx = true} : vector<8x1xf32> -> vector<8x1xf32>
      %91 = arith.mulf %88, %90 : vector<8x1xf32>
      %92 = arith.subf %87, %91 : vector<8x1xf32>
      %93 = vector.shape_cast %87 : vector<8x1xf32> to vector<8x1xf32>
      %94 = vector.broadcast %93 : vector<8x1xf32> to vector<8x128xf32>
      %c0_64 = arith.constant 0 : index
      %c0_65 = arith.constant 0 : index
      %95 = vector.load %arg7[%c0_64, %c0_65] : memref<8x128xf32, #tpu.memory_space<vmem>>, vector<8x128xf32>
      tpu.vector_store %arg7[%c0_64, %c0_65], %94 {strides = array<i32>} : memref<8x128xf32, #tpu.memory_space<vmem>>, vector<8x128xf32>,
      %96 = vector.shape_cast %92 : vector<8x1xf32> to vector<8x1xf32>
      %97 = vector.broadcast %96 : vector<8x1xf32> to vector<8x128xf32>
      %c0_66 = arith.constant 0 : index
      %c0_67 = arith.constant 0 : index
      %98 = vector.load %arg8[%c0_66, %c0_67] : memref<8x128xf32, #tpu.memory_space<vmem>>, vector<8x128xf32>
      tpu.vector_store %arg8[%c0_66, %c0_67], %97 {strides = array<i32>} : memref<8x128xf32, #tpu.memory_space<vmem>>, vector<8x128xf32>,
      %c0_68 = arith.constant 0 : index
      %c0_69 = arith.constant 0 : index
      %99 = vector.load %arg16[%c0_68, %c0_69] : memref<8x1xi32, #tpu.memory_space<vmem>>, vector<8x1xi32>
      %100 = vector.shape_cast %99 : vector<8x1xi32> to vector<8x1xi32>
      %101 = vector.broadcast %100 : vector<8x1xi32> to vector<8x128xi32>
      %c0_70 = arith.constant 0 : index
      %c0_71 = arith.constant 0 : index
      %102 = vector.load %arg9[%c0_70, %c0_71] : memref<8x128xi32, #tpu.memory_space<vmem>>, vector<8x128xi32>
      tpu.vector_store %arg9[%c0_70, %c0_71], %101 {strides = array<i32>} : memref<8x128xi32, #tpu.memory_space<vmem>>, vector<8x128xi32>,
    } else {
    }
    return
  }
  func.func @transform_0(%arg0: i32, %arg1: i32) -> (i32, i32) {
    %c0_i32 = arith.constant 0 : i32
    %c0_i32_0 = arith.constant 0 : i32
    return %arg0, %c0_i32 : i32, i32
  }
  func.func @transform_1(%arg0: i32, %arg1: i32) -> (i32, i32) {
    %c0_i32 = arith.constant 0 : i32
    %c0_i32_0 = arith.constant 0 : i32
    return %c0_i32, %arg1 : i32, i32
  }
  func.func @transform_2(%arg0: i32, %arg1: i32) -> (i32, i32) {
    %c0_i32 = arith.constant 0 : i32
    %c0_i32_0 = arith.constant 0 : i32
    return %c0_i32, %arg1 : i32, i32
  }
  func.func @transform_3(%arg0: i32, %arg1: i32) -> (i32, i32) {
    %c0_i32 = arith.constant 0 : i32
    return %arg0, %arg1 : i32, i32
  }
  func.func @transform_4(%arg0: i32, %arg1: i32) -> (i32, i32) {
    %c0_i32 = arith.constant 0 : i32
    return %arg0, %arg1 : i32, i32
  }
  func.func @transform_5(%arg0: i32, %arg1: i32) -> (i32, i32) {
    %c0_i32 = arith.constant 0 : i32
    %c0_i32_0 = arith.constant 0 : i32
    return %arg0, %c0_i32 : i32, i32
  }
  func.func @transform_6(%arg0: i32, %arg1: i32) -> (i32, i32) {
    %c0_i32 = arith.constant 0 : i32
    %c0_i32_0 = arith.constant 0 : i32
    return %arg0, %c0_i32 : i32, i32
  }
  func.func @transform_7(%arg0: i32, %arg1: i32) -> (i32, i32) {
    %c0_i32 = arith.constant 0 : i32
    %c0_i32_0 = arith.constant 0 : i32
    return %arg0, %c0_i32 : i32, i32
  }
}

</mosaic_0001>

<bundles_post_ra>
// kernel: cos.6
= control target key start
LH: loop header
LB: loop body
LE: loop exit
PB: predicated region body
PF: predicated region fallthrough
CT: control target
= control target key end

     0   :  { %v125_v12 = vmov 683565275   ;;  %v126_v14 = vmov 2475754826   ;;  %v127_v16 = vmov 2131351028   ;;  %s168_s0 = inlined_call_operand.vmem [shape: f32[380], index: 0, kind: input, shape index: {}]   ;;  %s169_s1 = inlined_call_operand.vmem [shape: f32[380], index: 1, kind: output, shape index: {}]  }
   0x1   :  { %v144_v0 = vld [vmem:[%s168_s0] sm:$0x7]  ;;  %v128_v18 = vmov 2102212464   ;;  %v129_v20 = vmov 920167782  }
   0x2   :  { %v6_v1 = vand.u32 2139095040, %v144_v0  ;;  %v3_v3 = vand.u32 2147483647, %v144_v0  ;;  %v130_v27 = vmov 1326507024   ;;  %vm5_vm7 = vcmp.lt.s32.totalorder %v144_v0, 0 }
   0x3   :  { %vm95_vm12 = vweird.f32 %v144_v0 }
   0x4   :  { %v7_v2 = vshrl.u32 %v6_v1, 23  ;;  %v10_v6 = vand.u32 8388607, %v3_v3  ;;  %vm4_vm8 = vcmp.le.f32.partialorder %v3_v3, 0.7853982 }
   0x6   :  { %v107_v4 = vadd.s32 4294967169, %v7_v2  ;;  %v11_v9 = vor.u32 8388608, %v10_v6 }
   0x8   :  { %v13_v5 = vadd.s32 1, %v107_v4  ;;  %v51_v29 = vshll.u32 %v11_v9, 8 }
   0xa   :  { %vm14_vm0 = vcmp.gt.s32.totalorder %v13_v5, 0 }
   0xb   :  { %v15_v7 = vsel %vm14_vm0, %v13_v5, 0 }
   0xc   :  { %v17_v8 = vand.u32 31, %v15_v7  ;;  %v16_v10 = vshrl.u32 %v15_v7, 5 }
   0xe   :  { %v18_v11 = vsub.s32 32, %v17_v8  ;;  %v20_v13 = vshll.u32 %v125_v12, %v17_v8  ;;  %v23_v15 = vshll.u32 %v126_v14, %v17_v8  ;;  %v26_v17 = vshll.u32 %v127_v16, %v17_v8 }
   0xf   :  { %v29_v19 = vshll.u32 %v128_v18, %v17_v8  ;;  %v32_v21 = vshll.u32 %v129_v20, %v17_v8  ;;  %vm35_vm1 = vcmp.lt.s32.totalorder %v16_v10, 1  ;;  %vm38_vm2 = vcmp.lt.s32.totalorder %v16_v10, 4 }
  0x10   :  { %v19_v22 = vshrl.u32 %v125_v12, %v18_v11  ;;  %v21_v23 = vshrl.u32 %v126_v14, %v18_v11  ;;  %v24_v24 = vshrl.u32 %v127_v16, %v18_v11  ;;  %v27_v25 = vshrl.u32 %v128_v18, %v18_v11 }
  0x11   :  { %v30_v26 = vshrl.u32 %v129_v20, %v18_v11  ;;  %v33_v28 = vshrl.u32 %v130_v27, %v18_v11  ;;  %vm36_vm3 = vcmp.lt.s32.totalorder %v16_v10, 2  ;;  %vm37_vm4 = vcmp.lt.s32.totalorder %v16_v10, 3 }
  0x12   :  { %v22_v30 = vor.u32 %v21_v23, %v20_v13  ;;  %v25_v31 = vor.u32 %v24_v24, %v23_v15  ;;  %v28_v32 = vor.u32 %v27_v25, %v26_v17 }
  0x13   :  { %v31_v33 = vor.u32 %v30_v26, %v29_v19  ;;  %v34_v34 = vor.u32 %v33_v28, %v32_v21 }
  0x14   :  { %v39_v35 = vsel %vm35_vm1, %v19_v22, %v22_v30  ;;  %v40_v36 = vsel %vm38_vm2, %v28_v32, 2102212464  ;;  %v43_v37 = vsel %vm35_vm1, %v22_v30, %v25_v31  ;;  %v47_v38 = vsel %vm35_vm1, %v25_v31, %v28_v32 }
  0x15   :  { %v41_v39 = vsel %vm37_vm4, %v25_v31, %v40_v36  ;;  %v44_v40 = vsel %vm38_vm2, %v31_v33, 920167782  ;;  %v48_v41 = vsel %vm38_vm2, %v34_v34, 1326507024 }
  0x16   :  { %v45_v42 = vsel %vm37_vm4, %v28_v32, %v44_v40  ;;  %v49_v43 = vsel %vm37_vm4, %v31_v33, %v48_v41  ;;  %v42_v44 = vsel %vm36_vm3, %v39_v35, %v41_v39 }
  0x17   :  { %v46_v45 = vsel %vm36_vm3, %v43_v37, %v45_v42  ;;  %v50_v46 = vsel %vm36_vm3, %v47_v38, %v49_v43  ;;  %v58_v51 = vmul.u32 %v51_v29, %v42_v44 }
  0x18   :  { %v150_v47 = vmul.u32.u64.low %v51_v29, %v50_v46  ;;  %v151_v48 = vmul.u32.u64.high %v51_v29, %v50_v46, %v150_v47  ;;  %v153_v49 = vmul.u32.u64.low %v51_v29, %v46_v45  ;;  %v154_v50 = vmul.u32.u64.high %v51_v29, %v46_v45, %v153_v49 }
  0x1a   :  { %vm60_vm5 = vc.u32 %v151_v48, %v153_v49  ;;  %v61_v52 = vadd.s32 1, %v154_v50  ;;  %v59_v63 = vadd.s32 %v153_v49, %v151_v48 }
  0x1c   :  { %v62_v53 = vsel %vm60_vm5, %v61_v52, %v154_v50 }
  0x1d   :  { %v63_v54 = vadd.s32 %v62_v53, %v58_v51 }
  0x1f   :  { %v64_v55 = vadd.s32 536870912, %v63_v54 }
  0x21   :  { %v65_v56 = vshrl.u32 %v64_v55, 30 }
  0x23   :  { %v66_v57 = vshll.u32 %v65_v56, 30  ;;  %v89_v14 = vsub.s32 4, %v65_v56 }
  0x25   :  { %v67_v58 = vsub.s32 %v63_v54, %v66_v57  ;;  %v90_v17 = vsel %vm5_vm7, %v89_v14, %v65_v56 }
  0x26   :  { %v92_v18 = vsel %vm4_vm8, 0, %v90_v17 }
  0x27   :  { %v69_v59 = vsub.s32 0, %v67_v58  ;;  %v96_v19 = vand.u32 3, %v92_v18 }
  0x29   :  { %v108_v60 = vmin.u32 %v69_v59, %v67_v58  ;;  %vm101_vm9 = vcmp.eq.s32.totalorder %v96_v19, 2  ;;  %vm98_vm10 = vcmp.eq.s32.totalorder %v96_v19, 0  ;;  %vm97_vm11 = vcmp.lt.s32.totalorder %v96_v19, 2 }
  0x2b   :  { %v71_v61 = vclz %v108_v60 }
  0x2d   :  { %v109_v62 = vadd.s32 4294967294, %v71_v61 }
  0x2f   :  { %vm110_vm6 = vcmp.lt.s32.totalorder %v109_v62, 0 }
  0x30   :  { %v74_v1 = vsel %vm110_vm6, 0, %v109_v62 }
  0x31   :  { %v75_v2 = vsub.s32 32, %v74_v1  ;;  %v76_v4 = vshll.u32 %v67_v58, %v74_v1  ;;  %v79_v5 = vsub.s32 4294967266, %v74_v1 }
  0x33   :  { %v77_v6 = vshrl.u32 %v59_v63, %v75_v2  ;;  %v80_v7 = vadd.s32 127, %v79_v5 }
  0x35   :  { %v78_v8 = vor.u32 %v77_v6, %v76_v4  ;;  %v81_v9 = vshll.u32 %v80_v7, 23 }
  0x37   :  { %v82_v10 = vor.u32 4788187, %v81_v9  ;;  %v85_v11 = vcvt.s32.f32 %v78_v8 }
  0x39   :  { %v83_v12 = vand.u32 2147483647, %v82_v10 }
  0x3b   :  { %v86_v13 = vmul.f32 %v85_v11, %v83_v12 }
  0x3d   :  { %v87_v3 = vxor.u32 2147483648, %v86_v13 }
  0x3f   :  { %v88_v15 = vsel %vm5_vm7, %v87_v3, %v86_v13 }
  0x40   :  { %v91_v16 = vsel %vm4_vm8, %v144_v0, %v88_v15 }
  0x41   :  { %121 = vcosq.f32 %v91_v16 }
  0x42   :  { %123 = vsinq.f32 %v91_v16 }
  0x4b   :  { %v122_v20 = vpop.eup %121 }
  0x4c   :  { %v124_v21 = vpop.eup %123  ;;  %v102_v22 = vxor.u32 2147483648, %v122_v20 }
  0x4d   :  { %v99_v23 = vxor.u32 2147483648, %v124_v21 }
  0x4e   :  { %v103_v0 = vsel %vm101_vm9, %v102_v22, %v124_v21 }
  0x4f   :  { %v100_v24 = vsel %vm98_vm10, %v122_v20, %v99_v23 }
  0x50   :  { %v104_v25 = vsel %vm97_vm11, %v100_v24, %v103_v0 }
  0x51   :  { %v105_v26 = vsel %vm95_vm12, nan, %v104_v25 }
  0x52   :  { %106 = vst [vmem:[%s169_s1] sm:$0xf] %v105_v26 }

// kernel: geolocation_forward.2
= control target key start
LH: loop header
LB: loop body
LE: loop exit
PB: predicated region body
PF: predicated region fallthrough
CT: control target
= control target key end

     0   :  { %6 = vsyncpa [#allocation3], 0  ;;  %s180_s6 = smov [#allocation2]   ;;  %s211_s0 = inlined_call_operand.hbm [shape: f32[8,24,128], index: 0, kind: input, shape index: {}]   ;;  %s212_s1 = inlined_call_operand.vmem [shape: f32[8,128], index: 1, kind: output, shape index: {}]  }
   0x1   :  { %s12_s7 = sshll.u32 %s180_s6, 4  ;;  %s156_s10 = scalar_lea.hbm %s211_s0, 3072  ;;  %s13_s7 = int_to_ptr.vmem [resolvable:$true] %s12_s7 }
   0x2   :  { %p157_p0 = scmp.ne.s32.totalorder %s211_s0, %s156_s10  ;;  %p160_p1 = scmp.lt.u32.totalorder %s156_s10, %s211_s0 }
   0x4   :  { %p162_p2 = pnand %p160_p1, %p157_p0 }
   0x6   :  { %165 = shalt.err (!%p162_p2)
}
   0x7   :  { %s166_s15 = scalar_lea.vmem %s13_s7, 3072  ;;  %p171_p4 = scmp.lt.s32.totalorder %s13_s7, %s13_s7 }
   0x8   :  { %p167_p3 = scmp.ne.s32.totalorder %s13_s7, %s166_s15  ;;  %p172_p5 = scmp.lt.s32.totalorder %s166_s15, %s166_s15 }
   0xa   :  { %p173_p6 = por %p172_p5, %p171_p4 }
   0xc   :  { %p174_p7 = pnand %p173_p6, %p167_p3 }
   0xe   :  { %177 = shalt.err (!%p174_p7)
}
   0xf   :  { %s181_s16 = smov 128   ;;  %s182_s17 = smov 8  }
  0x10   :  { %18 = dma.hbm_to_vmem [thread:$0]  %s211_s0, 3072, %s13_s7, [#allocation3], %s181_s16, %s181_s16, %s182_s17  }
  0x11   :  { %178 = dma.done.wait [#allocation3], 3072  }
  0x12   :  { %179 = vsyncadd [#allocation3], 4294964224  ;;  %v27_v0 = vld [vmem:[#allocation2] sm:$0xff]  ;;  %v28_v1 = vld [vmem:[#allocation2 + $0x8] sm:$0xff]  ;;  %vm124_vm0 = vcmask 1041409   ;;  %vm126_vm1 = vcmask 1042434  }
  0x13   :  { %v29_v2 = vld [vmem:[#allocation2 + $0x10] sm:$0xff]  ;;  %v30_v3 = vld [vmem:[#allocation2 + $0x18] sm:$0xff]  ;;  %v31_v4 = vld [vmem:[#allocation2 + $0x20] sm:$0xff]  ;;  %v52_v6 = vadd.f32 %v28_v1, %v27_v0  ;;  %vm128_vm2 = vcmask 1043459   ;;  %vm130_vm3 = vcmask 1044484   ;;  %vm132_vm4 = vcmask 1045509  }
  0x14   :  { %v32_v5 = vld [vmem:[#allocation2 + $0x28] sm:$0xff]  ;;  %v33_v7 = vld [vmem:[#allocation2 + $0x30] sm:$0xff]  ;;  %v34_v8 = vld [vmem:[#allocation2 + $0x38] sm:$0xff]  ;;  %v60_v10 = vadd.f32 %v31_v4, %v30_v3  ;;  %vm134_vm5 = vcmask 1046534   ;;  %vm136_vm6 = vcmask 1047559  }
  0x15   :  { %v35_v9 = vld [vmem:[#allocation2 + $0x40] sm:$0xff]  ;;  %v36_v11 = vld [vmem:[#allocation2 + $0x48] sm:$0xff]  ;;  %v37_v12 = vld [vmem:[#allocation2 + $0x50] sm:$0xff]  ;;  %v53_v14 = vadd.f32 %v52_v6, %v29_v2  ;;  %v68_v15 = vadd.f32 %v34_v8, %v33_v7 }
  0x16   :  { %v38_v13 = vld [vmem:[#allocation2 + $0x58] sm:$0xff]  ;;  %v39_v16 = vld [vmem:[#allocation2 + $0x60] sm:$0xff]  ;;  %v40_v17 = vld [vmem:[#allocation2 + $0x68] sm:$0xff]  ;;  %v61_v19 = vadd.f32 %v60_v10, %v32_v5  ;;  %v76_v20 = vadd.f32 %v37_v12, %v36_v11 }
  0x17   :  { %v41_v18 = vld [vmem:[#allocation2 + $0x70] sm:$0xff]  ;;  %v42_v21 = vld [vmem:[#allocation2 + $0x78] sm:$0xff]  ;;  %v43_v22 = vld [vmem:[#allocation2 + $0x80] sm:$0xff]  ;;  %v54_v24 = vrot.slane %v53_v14, 4  ;;  %v69_v25 = vadd.f32 %v68_v15, %v35_v9  ;;  %v84_v26 = vadd.f32 %v40_v17, %v39_v16 }
  0x18   :  { %v44_v23 = vld [vmem:[#allocation2 + $0x88] sm:$0xff]  ;;  %v45_v27 = vld [vmem:[#allocation2 + $0x90] sm:$0xff]  ;;  %v46_v28 = vld [vmem:[#allocation2 + $0x98] sm:$0xff]  ;;  %v62_v30 = vrot.slane %v61_v19, 4  ;;  %v77_v31 = vadd.f32 %v76_v20, %v38_v13  ;;  %v92_v32 = vadd.f32 %v43_v22, %v42_v21 }
  0x19   :  { %v47_v29 = vld [vmem:[#allocation2 + $0xa0] sm:$0xff]  ;;  %v48_v33 = vld [vmem:[#allocation2 + $0xa8] sm:$0xff]  ;;  %v49_v34 = vld [vmem:[#allocation2 + $0xb0] sm:$0xff]  ;;  %v55_v36 = vadd.f32 %v54_v24, %v53_v14  ;;  %v70_v37 = vrot.slane %v69_v25, 4  ;;  %v85_v38 = vadd.f32 %v84_v26, %v41_v18  ;;  %v100_v39 = vadd.f32 %v46_v28, %v45_v27 }
  0x1a   :  { %v50_v35 = vld [vmem:[#allocation2 + $0xb8] sm:$0xff]  ;;  %v63_v40 = vadd.f32 %v62_v30, %v61_v19  ;;  %v78_v41 = vrot.slane %v77_v31, 4  ;;  %v93_v42 = vadd.f32 %v92_v32, %v44_v23  ;;  %v108_v43 = vadd.f32 %v49_v34, %v48_v33 }
  0x1b   :  { %v56_v44 = vrot.slane %v55_v36, 2  ;;  %v71_v45 = vadd.f32 %v70_v37, %v69_v25  ;;  %v86_v46 = vrot.slane %v85_v38, 4  ;;  %v101_v47 = vadd.f32 %v100_v39, %v47_v29 }
  0x1c   :  { %v64_v48 = vrot.slane %v63_v40, 2  ;;  %v79_v49 = vadd.f32 %v78_v41, %v77_v31  ;;  %v94_v50 = vrot.slane %v93_v42, 4  ;;  %v109_v51 = vadd.f32 %v108_v43, %v50_v35 }
  0x1d   :  { %v57_v52 = vadd.f32 %v56_v44, %v55_v36  ;;  %v72_v53 = vrot.slane %v71_v45, 2  ;;  %v87_v54 = vadd.f32 %v86_v46, %v85_v38  ;;  %v102_v55 = vrot.slane %v101_v47, 4 }
  0x1e   :  { %v65_v56 = vadd.f32 %v64_v48, %v63_v40  ;;  %v80_v57 = vrot.slane %v79_v49, 2  ;;  %v95_v58 = vadd.f32 %v94_v50, %v93_v42  ;;  %v110_v59 = vrot.slane %v109_v51, 4 }
  0x1f   :  { %v58_v60 = vrot.slane %v57_v52, 1  ;;  %v73_v61 = vadd.f32 %v72_v53, %v71_v45  ;;  %v88_v62 = vrot.slane %v87_v54, 2  ;;  %v103_v63 = vadd.f32 %v102_v55, %v101_v47 }
  0x20   :  { %v66_v0 = vrot.slane %v65_v56, 1  ;;  %v81_v1 = vadd.f32 %v80_v57, %v79_v49  ;;  %v96_v2 = vrot.slane %v95_v58, 2  ;;  %v111_v3 = vadd.f32 %v110_v59, %v109_v51 }
  0x21   :  { %v59_v4 = vadd.f32 %v58_v60, %v57_v52  ;;  %v74_v5 = vrot.slane %v73_v61, 1  ;;  %v89_v6 = vadd.f32 %v88_v62, %v87_v54  ;;  %v104_v7 = vrot.slane %v103_v63, 2 }
  0x22   :  { %v67_v8 = vadd.f32 %v66_v0, %v65_v56  ;;  %v82_v9 = vrot.slane %v81_v1, 1  ;;  %v97_v10 = vadd.f32 %v96_v2, %v95_v58  ;;  %v112_v11 = vrot.slane %v111_v3, 2 }
  0x23   :  { %v75_v12 = vadd.f32 %v74_v5, %v73_v61  ;;  %v90_v13 = vrot.slane %v89_v6, 1  ;;  %v105_v14 = vadd.f32 %v104_v7, %v103_v63 }
  0x24   :  { %v83_v15 = vadd.f32 %v82_v9, %v81_v1  ;;  %v98_v16 = vrot.slane %v97_v10, 1  ;;  %v113_v17 = vadd.f32 %v112_v11, %v111_v3  ;;  %v125_v18 = vsel %vm124_vm0, %v67_v8, %v59_v4 }
  0x25   :  { %v91_v19 = vadd.f32 %v90_v13, %v89_v6  ;;  %v106_v20 = vrot.slane %v105_v14, 1  ;;  %v127_v21 = vsel %vm126_vm1, %v75_v12, %v125_v18 }
  0x26   :  { %v99_v22 = vadd.f32 %v98_v16, %v97_v10  ;;  %v114_v23 = vrot.slane %v113_v17, 1  ;;  %v129_v24 = vsel %vm128_vm2, %v83_v15, %v127_v21 }
  0x27   :  { %v107_v25 = vadd.f32 %v106_v20, %v105_v14  ;;  %v131_v26 = vsel %vm130_vm3, %v91_v19, %v129_v24 }
  0x28   :  { %v115_v27 = vadd.f32 %v114_v23, %v113_v17  ;;  %v133_v28 = vsel %vm132_vm4, %v99_v22, %v131_v26 }
  0x29   :  { %v135_v29 = vsel %vm134_vm5, %v107_v25, %v133_v28 }
  0x2a   :  { %v137_v30 = vsel %vm136_vm6, %v115_v27, %v135_v29 }
  0x2b   :  { %v145_v31 = vmul.f32 0.041666668, %v137_v30 }
  0x2d   :  { %146 = vst [vmem:[%s212_s1] sm:$0xff] %v145_v31 }
  0x2e   :  { %151 = vsyncpa [#allocation3], 1 }

// kernel: geolocation_forward.3
= control target key start
LH: loop header
LB: loop body
LE: loop exit
PB: predicated region body
PF: predicated region fallthrough
CT: control target
= control target key end

     0   :  { %vm26_vm0 = vcmask 7168   ;;  %v589_v0 = vmov 0.0   ;;  %vm590_vm1 = vmmov 0   ;;  %v591_v2 = vmov 0   ;;  %s832_s1 = inlined_call_operand.vmem [shape: bf16[128,384], index: 1, kind: input, shape index: {}]   ;;  %s833_s0 = inlined_call_operand.vmem [shape: f32[8,128], index: 0, kind: input, shape index: {}]   ;;  %s834_s2 = inlined_call_operand.vmem [shape: f32[1,384], index: 2, kind: input, shape index: {}]   ;;  %s835_s3 = inlined_call_operand.vmem [shape: f32[8,384], index: 3, kind: input, shape index: {}]   ;;  %s836_s4 = inlined_call_operand.vmem [shape: f32[8,384], index: 4, kind: output, shape index: {0}]   ;;  %s837_s5 = inlined_call_operand.vmem [shape: f32[8,128], index: 5, kind: output, shape index: {1}]   ;;  %s838_s6 = inlined_call_operand.vmem [shape: f32[8,128], index: 6, kind: output, shape index: {2}]   ;;  %s839_s7 = inlined_call_operand.vmem [shape: s32[8,128], index: 7, kind: output, shape index: {3}]  }
   0x1   :  { %511 = vmatprep.subr.bf16.mxu1 %v589_v0  ;;  %v537_v1 = vld [vmem:[%s832_s1 + $0x4] ss:$12 sps:$4 sm:$0xff]   ;;  %527 = vmatprep.mubr.msk.bf16.mxu1 %vm590_vm1, %v589_v0  ;;  %33 = vst.msk [vmem:[#allocation8] sm:$0xff] %vm26_vm0, %v591_v2  ;;  %28 = vst.msk [vmem:[#allocation3] sm:$0xff] %vm26_vm0, %v589_v0  ;;  %v539_v3 = vld [vmem:[%s832_s1 + $0x8] ss:$12 sps:$4 sm:$0xff]   ;;  %v70_v28 = vlaneseq }
   0x2   :  { %30 = vst.msk [vmem:[#allocation5] sm:$0xff] %vm26_vm0, %v589_v0  ;;  %31 = vst.msk [vmem:[#allocation6] sm:$0xff] %vm26_vm0, %v589_v0  ;;  %245 = vmatprep.mubr.bf16.mxu0 %v591_v2  ;;  %535 = vset.pattern.permute.xlu1 %v591_v2  ;;  %v540_v4 = vld [vmem:[%s832_s1] ss:$12 sps:$4 sm:$0xff]   ;;  %v541_v5 = vld [vmem:[%s832_s1 + $0x1c] ss:$12 sps:$4 sm:$0xff]  }
   0x3   :  { %213 = vmatprep.subr.bf16.mxu0 %v537_v1  ;;  %536 = vset.pattern.permute.xlu0 %v591_v2  ;;  %v543_v6 = vld [vmem:[%s832_s1 + $0x20] ss:$12 sps:$4 sm:$0xff]   ;;  %v544_v7 = vld [vmem:[%s832_s1 + $0x18] ss:$12 sps:$4 sm:$0xff]   ;;  %v548_v10 = vld [vmem:[%s832_s1 + $0x30] ss:$12 sps:$4 sm:$0xff]  }
   0x4   :  { %512 = vmatpush3.bf16.msra.mxu1 %v539_v3  ;;  %214 = vmatpush1.bf16.msra.mxu0 %v540_v4  ;;  %v545_v8 = vld [vmem:[%s832_s1 + $0x34] ss:$12 sps:$4 sm:$0xff]   ;;  %v547_v9 = vld [vmem:[%s832_s1 + $0x38] ss:$12 sps:$4 sm:$0xff]   ;;  %v551_v12 = vld [vmem:[%s832_s1 + $0x50] ss:$12 sps:$4 sm:$0xff]  }
   0x5   :  { %513 = vmatprep.subr.bf16.mxu1 %v589_v0  ;;  %215 = vmatprep.subr.bf16.mxu0 %v541_v5  ;;  %v549_v11 = vld [vmem:[%s832_s1 + $0x4c] ss:$12 sps:$4 sm:$0xff]   ;;  %v552_v13 = vld [vmem:[%s832_s1 + $0x48] ss:$12 sps:$4 sm:$0xff]   ;;  %v553_v14 = vld [vmem:[%s832_s1 + $0x64] ss:$12 sps:$4 sm:$0xff]  }
   0x6   :  { %v555_v15 = vld [vmem:[%s832_s1 + $0x68] ss:$12 sps:$4 sm:$0xff]   ;;  %v556_v16 = vld [vmem:[%s832_s1 + $0x60] ss:$12 sps:$4 sm:$0xff]   ;;  %v560_v19 = vld [vmem:[%s832_s1 + $0x78] ss:$12 sps:$4 sm:$0xff]  }
   0x7   :  { %v557_v17 = vld [vmem:[%s832_s1 + $0x7c] ss:$12 sps:$4 sm:$0xff]   ;;  %v559_v18 = vld [vmem:[%s832_s1 + $0x80] ss:$12 sps:$4 sm:$0xff]   ;;  %v563_v21 = vld [vmem:[%s832_s1 + $0x98] ss:$12 sps:$4 sm:$0xff]  }
   0x8   :  { %514 = vmatpush3.bf16.msra.mxu1 %v543_v6  ;;  %216 = vmatpush1.bf16.msra.mxu0 %v544_v7  ;;  %v561_v20 = vld [vmem:[%s832_s1 + $0x94] ss:$12 sps:$4 sm:$0xff]   ;;  %v564_v22 = vld [vmem:[%s832_s1 + $0x90] ss:$12 sps:$4 sm:$0xff]   ;;  %v565_v23 = vld [vmem:[%s832_s1 + $0xac] ss:$12 sps:$4 sm:$0xff]  }
   0x9   :  { %515 = vmatprep.subr.bf16.mxu1 %v589_v0  ;;  %217 = vmatprep.subr.bf16.mxu0 %v545_v8  ;;  %v567_v24 = vld [vmem:[%s832_s1 + $0xb0] ss:$12 sps:$4 sm:$0xff]   ;;  %v34_v25 = vld [vmem:[%s833_s0] sm:$0xff]  ;;  %v568_v26 = vld [vmem:[%s832_s1 + $0xa8] ss:$12 sps:$4 sm:$0xff]   ;;  %v71_v29 = vshrl.u32 %v70_v28, 7 }
   0xa   :  { %v35_v27 = vpack.c.bf16 %v34_v25, %v34_v25  ;;  %v298_v30 = vand.u32 127, %v70_v28  ;;  %v68_v33 = vld [vmem:[%s834_s2] sm:$0x7]  ;;  %v378_v39 = vld [vmem:[%s835_s3 + $0x8] sm:$0xff]  ;;  %v379_v41 = vld [vmem:[%s835_s3 + $0x10] sm:$0xff]  ;;  %v592_v62 = vmov -inf  }
   0xb   :  { %v80_v31 = vsub.s32 2, %v71_v29  ;;  %v72_v32 = vsub.s32 0, %v71_v29  ;;  %v76_v34 = vsub.s32 1, %v71_v29  ;;  %v377_v38 = vld [vmem:[%s835_s3] sm:$0xff]  ;;  %v743_v47 = vmul.f32 -0.013333334, %v378_v39 }
   0xc   :  { %516 = vmatpush3.bf16.msra.mxu1 %v547_v9  ;;  %218 = vmatpush1.bf16.msra.mxu0 %v548_v10  ;;  %v727_v35 = vadd.s32 256, %v298_v30  ;;  %v741_v46 = vmul.f32 -0.013333334, %v377_v38  ;;  %v382_v51 = vmul.f32 -0.013333334, %v379_v41  ;;  %27 = vst.msk [vmem:[#allocation2] sm:$0xff] %vm26_vm0, %v592_v62 }
   0xd   :  { %517 = vmatprep.subr.bf16.mxu1 %v589_v0  ;;  %219 = vmatprep.subr.bf16.mxu0 %v549_v11  ;;  %v81_v36 = vrot.slane %v68_v33, %v80_v31  ;;  %v73_v37 = vrot.slane %v68_v33, %v72_v32  ;;  %v77_v40 = vrot.slane %v68_v33, %v76_v34 }
   0xe   :  { %vm308_vm2 = vcmp.lt.s32.totalorder %v727_v35, 380  ;;  %v386_v58 = vmax.f32 %v741_v46, %v743_v47  ;;  %32 = vst.msk [vmem:[#allocation7] sm:$0xff] %vm26_vm0, %v592_v62  ;;  %29 = vst.msk [vmem:[#allocation4] sm:$0xff] %vm26_vm0, %v592_v62  ;;  %v420_v62 = vld [vmem:[#allocation6] sm:$0xff] }
   0xf   :  { %v385_v59 = vsel %vm308_vm2, %v382_v51, -1e+30 }
  0x10   :  { %518 = vmatpush3.bf16.msra.mxu1 %v551_v12  ;;  %220 = vmatpush1.bf16.msra.mxu0 %v552_v13  ;;  %v387_v61 = vmax.f32 %v386_v58, %v385_v59 }
  0x11   :  { %519 = vmatprep.subr.bf16.mxu1 %v589_v0  ;;  %221 = vmatprep.subr.bf16.mxu0 %v553_v14 }
  0x13   :  { %v773_v63 = vld [vmem:[#allocation2] sm:$0xff] }
  0x14   :  { %520 = vmatpush3.bf16.msra.mxu1 %v555_v15  ;;  %222 = vmatpush1.bf16.msra.mxu0 %v556_v16 }
  0x15   :  { %521 = vmatprep.subr.bf16.mxu1 %v589_v0  ;;  %223 = vmatprep.subr.bf16.mxu0 %v557_v17  ;;  %v775_v1 = vld [vmem:[#allocation7] sm:$0xff]  ;;  %v788_v4 = vld [vmem:[#allocation4] sm:$0xff] }
  0x18   :  { %522 = vmatpush3.bf16.msra.mxu1 %v559_v18  ;;  %224 = vmatpush1.bf16.msra.mxu0 %v560_v19 }
  0x19   :  { %523 = vmatprep.subr.bf16.mxu1 %v589_v0  ;;  %225 = vmatprep.subr.bf16.mxu0 %v561_v20 }
  0x1c   :  { %524 = vmatpush3.bf16.msra.mxu1 %v563_v21  ;;  %226 = vmatpush1.bf16.msra.mxu0 %v564_v22 }
  0x1d   :  { %525 = vmatprep.subr.bf16.mxu1 %v589_v0  ;;  %227 = vmatprep.subr.bf16.mxu0 %v565_v23  ;;  %v299_v0 = vadd.s32 128, %v298_v30 }
  0x20   :  { %526 = vmatpush3.bf16.msra.mxu1 %v567_v24  ;;  %228 = vmatpush1.bf16.msra.mxu0 %v568_v26 }
  0x23   :  { %528 = vmatmul.mubr.bf16.vlgmr.msra.gmra.mrb[0].mxu1 %v35_v27  ;;  %246 = vmatmul.mubr.bf16.vlgmr.msra.gmra.mrb[0].mxu0 %v35_v27 }
  0xf6   :  { %v288_v42 = vpop.f32.mrb[0].mxu1  ;;  %v247_v44 = vpop.f32.mrb[0].mxu0 }
  0xf7   :  { %v739_v43 = vadd.f32 %v288_v42, %v81_v36  ;;  %v529_v45 = vpop.f32.mrb[1].mxu1  ;;  %v745_v48 = vadd.f32 %v247_v44, %v73_v37  ;;  %v249_v49 = vpop.f32.mrb[1].mxu0 }
  0xf8   :  { %v291_v50 = vpop.f32.mrb[2].mxu1  ;;  %v751_v52 = vadd.f32 %v249_v49, %v77_v40  ;;  %v251_v53 = vpop.f32.mrb[2].mxu0 }
  0xf9   :  { %296 = vst [vmem:[%s836_s4 + $0x10] sm:$0xff] %v739_v43  ;;  %v530_v54 = vpop.f32.mrb[3].mxu1  ;;  %294 = vst [vmem:[%s836_s4] sm:$0xff] %v745_v48  ;;  %v252_v55 = vpop.f32.mrb[3].mxu0  ;;  %v311_v56 = vsel %vm308_vm2, %v739_v43, -1e+30 }
  0xfa   :  { %295 = vst [vmem:[%s836_s4 + $0x8] sm:$0xff] %v751_v52  ;;  %v312_v57 = vmax.f32 %v745_v48, %v751_v52 }
  0xfc   :  { %v313_v60 = vmax.f32 %v312_v57, %v311_v56 }
  0xfe   :  { %314 = vmax.xlane.f32.xlu0 %v313_v60 }
 0x102   :  { %388 = vmax.xlane.f32.xlu0 %v387_v61 }
 0x18b   :  { %v777_v2 = vpop.xlane.xlu0 %314 }
 0x18c   :  { %v781_v3 = vmax.f32 %v773_v63, %v777_v2  ;;  %vm345_vm3 = vcmp.eq.f32.partialorder %v745_v48, %v777_v2  ;;  %vm346_vm4 = vcmp.eq.f32.partialorder %v751_v52, %v777_v2  ;;  %vm347_vm5 = vcmp.eq.f32.partialorder %v311_v56, %v777_v2 }
 0x18d   :  { %v348_v5 = vsel %vm345_vm3, %v298_v30, 1073741824  ;;  %v349_v6 = vsel %vm346_vm4, %v299_v0, 1073741824  ;;  %vm370_vm6 = vcmp.gt.f32.partialorder %v777_v2, %v775_v1  ;;  %v350_v10 = vsel %vm347_vm5, %v727_v35, 1073741824  ;;  %v318_v35 = vld [vmem:[#allocation3] sm:$0xff] }
 0x18e   :  { %325 = vperm.xlu1 %535, %v781_v3   ;;  %v319_v7 = vsub.f32 %v773_v63, %v781_v3  ;;  %344 = vst.msk [vmem:[#allocation2] sm:$0xff] %vm26_vm0, %v781_v3  ;;  %vm351_vm7 = vcmp.lt.s32.totalorder %v348_v5, %v349_v6  ;;  %v375_v8 = vsel %vm370_vm6, %v777_v2, %v775_v1 }
 0x18f   :  { %v389_v9 = vpop.xlane.xlu0 %388  ;;  %v352_v11 = vsel %vm351_vm7, %v348_v5, %v349_v6  ;;  %376 = vst.msk [vmem:[#allocation7] sm:$0xff] %vm26_vm0, %v375_v8 }
 0x190   :  { %v391_v12 = vmax.f32 %v788_v4, %v389_v9  ;;  %vm353_vm8 = vcmp.lt.s32.totalorder %v352_v11, %v350_v10  ;;  %v320_v54 = vmul.f32 1.442695, %v319_v7 }
 0x191   :  { %v354_v13 = vsel %vm353_vm8, %v352_v11, %v350_v10  ;;  %v371_v10 = vld [vmem:[#allocation8] sm:$0xff] }
 0x192   :  { %v392_v14 = vsub.f32 %v788_v4, %v391_v12  ;;  %431 = vst.msk [vmem:[#allocation4] sm:$0xff] %vm26_vm0, %v391_v12  ;;  %397 = vperm.xlu1 %535, %v391_v12   ;;  %v356_v15 = vshra.s32 %v354_v13, 16  ;;  %v355_v50 = vand.u32 65535, %v354_v13 }
 0x194   :  { %v358_v16 = vcvt.s32.f32 %v356_v15  ;;  %v357_v53 = vcvt.s32.f32 %v355_v50  ;;  %v393_v55 = vmul.f32 1.442695, %v392_v14 }
 0x196   :  { %359 = vmin.xlane.f32.xlu0 %v358_v16 }
 0x20d   :  { %v326_v17 = vpop.permute.xlu1 %325 }
 0x20e   :  { %v328_v18 = vsub.f32 %v745_v48, %v326_v17  ;;  %v329_v19 = vsub.f32 %v751_v52, %v326_v17  ;;  %v330_v20 = vsub.f32 %v311_v56, %v326_v17 }
 0x210   :  { %v331_v21 = vmul.f32 1.442695, %v328_v18  ;;  %v333_v22 = vmul.f32 1.442695, %v329_v19  ;;  %v335_v23 = vmul.f32 1.442695, %v330_v20 }
 0x211   :  { %v398_v24 = vpop.permute.xlu1 %397 }
 0x212   :  { %569 = vpow2.f32 %v331_v21  ;;  %v400_v25 = vsub.f32 %v741_v46, %v398_v24  ;;  %v401_v26 = vsub.f32 %v743_v47, %v398_v24  ;;  %v402_v27 = vsub.f32 %v385_v59, %v398_v24 }
 0x213   :  { %571 = vpow2.f32 %v333_v22 }
 0x214   :  { %v403_v28 = vmul.f32 1.442695, %v400_v25  ;;  %v405_v29 = vmul.f32 1.442695, %v401_v26  ;;  %v407_v30 = vmul.f32 1.442695, %v402_v27  ;;  %573 = vpow2.f32 %v335_v23 }
 0x216   :  { %575 = vpow2.f32 %v403_v28 }
 0x217   :  { %577 = vpow2.f32 %v405_v29 }
 0x218   :  { %579 = vpow2.f32 %v407_v30 }
 0x219   :  { %581 = vpow2.f32 %v320_v54 }
 0x21a   :  { %583 = vpow2.f32 %v393_v55 }
 0x21c   :  { %v570_v31 = vpop.eup %569 }
 0x21d   :  { %v572_v32 = vpop.eup %571 }
 0x21e   :  { %v337_v33 = vadd.f32 %v572_v32, %v570_v31  ;;  %v574_v34 = vpop.eup %573 }
 0x220   :  { %v576_v36 = vpop.eup %575  ;;  %v338_v37 = vadd.f32 %v574_v34, %v337_v33 }
 0x221   :  { %v578_v38 = vpop.eup %577  ;;  %v422_v39 = vmul.f32 %v576_v36, %v745_v48 }
 0x222   :  { %v580_v40 = vpop.eup %579  ;;  %339 = vadd.xlane.f32.xlu1 %v338_v37  ;;  %v414_v41 = vadd.f32 %v578_v38, %v576_v36  ;;  %v423_v42 = vmul.f32 %v578_v38, %v751_v52 }
 0x223   :  { %v411_v44 = vsel %vm308_vm2, %v580_v40, 0.0  ;;  %v360_v49 = vpop.xlane.xlu0 %359  ;;  %v582_v52 = vpop.eup %581 }
 0x224   :  { %v415_v45 = vadd.f32 %v414_v41, %v411_v44  ;;  %v424_v46 = vmul.f32 %v411_v44, %v739_v43  ;;  %v425_v47 = vadd.f32 %v423_v42, %v422_v39  ;;  %vm361_vm9 = vcmp.eq.f32.partialorder %v358_v16, %v360_v49  ;;  %v584_v57 = vpop.eup %583  ;;  %v412_v43 = vld [vmem:[#allocation5] sm:$0xff]  ;;  %v435_v16 = vld [vmem:[#allocation2] sm:$0xff] }
 0x225   :  { %v362_v48 = vsel %vm361_vm9, %v357_v53, inf  ;;  %v322_v56 = vmul.f32 %v582_v52, %v318_v35  ;;  %v413_v60 = vmul.f32 %v584_v57, %v412_v43  ;;  %v421_v0 = vmul.f32 %v584_v57, %v420_v62 }
 0x226   :  { %416 = vadd.xlane.f32.xlu0 %v415_v45  ;;  %v426_v51 = vadd.f32 %v425_v47, %v424_v46  ;;  %v366_v4 = vcvt.f32.s32 %v360_v49 }
 0x228   :  { %v367_v8 = vshll.u32 %v366_v4, 16 }
 0x22a   :  { %427 = vadd.xlane.f32.xlu0 %v426_v51 }
 0x22e   :  { %363 = vmin.xlane.f32.xlu0 %v362_v48 }
 0x2af   :  { %v340_v58 = vpop.xlane.xlu1 %339 }
 0x2b0   :  { %v341_v59 = vadd.f32 %v340_v58, %v322_v56 }
 0x2b2   :  { %343 = vst.msk [vmem:[#allocation3] sm:$0xff] %vm26_vm0, %v341_v59 }
 0x2b3   :  { %v417_v61 = vpop.xlane.xlu0 %416 }
 0x2b4   :  { %v418_v63 = vadd.f32 %v417_v61, %v413_v60 }
 0x2b6   :  { %419 = vst.msk [vmem:[#allocation5] sm:$0xff] %vm26_vm0, %v418_v63 }
 0x2b7   :  { %v428_v3 = vpop.xlane.xlu0 %427 }
 0x2b8   :  { %v429_v5 = vadd.f32 %v428_v3, %v421_v0 }
 0x2b9   :  { %v436_v6 = vld [vmem:[#allocation3] sm:$0xff] }
 0x2ba   :  { %430 = vst.msk [vmem:[#allocation6] sm:$0xff] %vm26_vm0, %v429_v5  ;;  %585 = vlog2.f32 %v436_v6 }
 0x2bb   :  { %v364_v7 = vpop.xlane.xlu0 %363 }
 0x2bc   :  { %v365_v9 = vcvt.f32.s32 %v364_v7 }
 0x2bd   :  { %v441_v11 = vld [vmem:[#allocation5] sm:$0xff] }
 0x2be   :  { %v368_v12 = vadd.s32 %v367_v8, %v365_v9  ;;  %587 = vrcp.f32 %v441_v11 }
 0x2c0   :  { %v372_v13 = vsel %vm370_vm6, %v368_v12, %v371_v10 }
 0x2c1   :  { %373 = vst.msk [vmem:[#allocation8] sm:$0xff] %vm26_vm0, %v372_v13  ;;  %v440_v19 = vld [vmem:[#allocation6] sm:$0xff] }
 0x2c4   :  { %v586_v14 = vpop.eup %585 }
 0x2c5   :  { %v438_v15 = vmul.f32 0.6931472, %v586_v14 }
 0x2c7   :  { %v439_v17 = vadd.f32 %v438_v15, %v435_v16 }
 0x2c8   :  { %v588_v18 = vpop.eup %587  ;;  %v457_v22 = vld [vmem:[#allocation8] sm:$0xff] }
 0x2c9   :  { %447 = vperm.xlu0 %536, %v439_v17   ;;  %v443_v20 = vmul.f32 %v588_v18, %v440_v19 }
 0x2cb   :  { %v444_v21 = vsub.f32 %v439_v17, %v443_v20 }
 0x2cd   :  { %453 = vperm.xlu1 %535, %v444_v21  }
 0x2d1   :  { %459 = vperm.xlu1 %535, %v457_v22  }
 0x348   :  { %v448_v23 = vpop.permute.xlu0 %447 }
 0x349   :  { %450 = vst [vmem:[%s837_s5] sm:$0xff] %v448_v23 }
 0x34c   :  { %v454_v1 = vpop.permute.xlu1 %453 }
 0x34d   :  { %456 = vst [vmem:[%s838_s6] sm:$0xff] %v454_v1 }
 0x350   :  { %v460_v2 = vpop.permute.xlu1 %459 }
 0x351   :  { %461 = vst [vmem:[%s839_s7] sm:$0xff] %v460_v2 }

</bundles_post_ra>
